<compile_context>
chip_gen: v7x
topology: tpu7x:2x2x1
jax: 0.10.0
libtpu: 0.0.40
codegen_flags: <defaults>
</compile_context>

<pallas_src>
import functools

import jax
import jax.numpy as jnp
from jax.experimental import pallas as pl
from jax.experimental.pallas import tpu as pltpu


def _round_up(a: int, b: int) -> int:
    return (a + b - 1) // b * b


def make_sconv1d_kernel(kernel_size: int, stride: int, l_tile: int,
                        halo: int, c_pad: int):
    """Fused depthwise conv + pointwise conv + PReLU + BatchNorm (inference)."""

    def kernel(x_ref, halo_ref, wdw_ref, wpw_ref, pvec_ref, a_ref, o_ref, win_ref):
        # x_ref   : (1, stride*Cp, Ltile)      bf16  phase-decomposed input tile
        # halo_ref: (1, 1, stride*Cp, H)       bf16  right halo of this tile
        # wdw_ref : (Cp, K)                    f32   depthwise weights
        # wpw_ref : (Op, Cp)                   bf16  pointwise weights
        # pvec_ref: (Op, 3)                    f32   [fused bias, bn scale, bn shift]
        # a_ref   : (1,) in SMEM               f32   PReLU alpha (shared scalar)
        # o_ref   : (1, Op, Ltile)             f32
        # win_ref : (stride*Cp, Ltile+H) VMEM  bf16  assembled window scratch

        # Assemble (tile + halo) window once; every tap below is then a cheap
        # contiguous lane slice (phase decomposition removes strided loads).
        win_ref[:, :l_tile] = x_ref[0]
        win_ref[:, l_tile:l_tile + halo] = halo_ref[0, 0]

        wdw = wdw_ref[...]                                   # (Cp, K) f32
        acc = jnp.zeros((c_pad, l_tile), jnp.float32)
        for k in range(kernel_size):                         # static unroll
            p, q = k % stride, k // stride
            xk = win_ref[p * c_pad:(p + 1) * c_pad, q:q + l_tile].astype(jnp.float32)
            acc = acc + wdw[:, k:k + 1] * xk
        y = acc.astype(jnp.bfloat16)      # depthwise out (its bias is folded into pw bias)

        # Pointwise 1x1 conv == matmul over channels: bf16 MXU, f32 accumulate.
        z = jnp.dot(wpw_ref[...], y, preferred_element_type=jnp.float32)   # (Op, Ltile)
        z = z + pvec_ref[:, 0:1]          # pointwise bias + folded depthwise bias

        # PReLU (single shared parameter, scalar from SMEM).
        alpha = a_ref[0]
        z = jnp.where(z >= 0.0, z, alpha * z)

        # BatchNorm1d (inference) folded into one multiply-add.
        z = z * pvec_ref[:, 1:2] + pvec_ref[:, 2:3]

        o_ref[0] = z.astype(o_ref.dtype)

    return kernel


def sconv1d_forward(x, params, *, kernel_size, stride=1, pad=0, eps=1e-5,
                    l_tile=512, vmem_budget_bytes=24 * 1024 * 1024):
    """x: (N, C_in, L) float32. Returns (N, C_out, L_out) float32."""
    N, C, L = x.shape
    K, s = kernel_size, stride
    O = params["w_pw"].shape[0]
    Lout = (L + 2 * pad - K) // s + 1
    assert Lout > 0

    Cp = _round_up(C, 16)     # bf16 sublane-friendly
    Op = _round_up(O, 8)      # f32 sublane-friendly

    # ---- pick a lane-dense length tile (multiple of 128) that fits VMEM ----
    lt = max(128, min(_round_up(l_tile, 128), _round_up(Lout, 128)))
    while lt > 128:
        working = 2 * (s * Cp * lt * 2 + Op * lt * 4) + s * Cp * lt * 2
        if working <= vmem_budget_bytes:
            break
        lt = max(128, (lt // 2) // 128 * 128)
    n_lt = -(-Lout // lt)                       # number of length tiles
    halo = max((K - 1) // s, 1)                 # per-phase right halo
    assert halo <= lt

    # ---- phase decomposition + padding (wrapper-side, XLA) ----
    t_big = (n_lt + 1) * lt                     # per-phase length incl. spare tile
    l_tot = t_big * s
    xp = jnp.pad(x, ((0, 0), (0, Cp - C), (pad, 0)))
    if xp.shape[2] < l_tot:
        xp = jnp.pad(xp, ((0, 0), (0, 0), (0, l_tot - xp.shape[2])))
    else:
        xp = xp[:, :, :l_tot]
    xp = xp.astype(jnp.bfloat16)
    # x_ph[n, p, c, t] == x_padded[n, c, t*stride + p]
    x_ph = xp.reshape(N, Cp, t_big, s).transpose(0, 3, 1, 2)      # (N, s, Cp, t_big)
    x_main = x_ph.reshape(N, s * Cp, t_big)
    x_halo = (x_ph[..., lt:]
              .reshape(N, s, Cp, n_lt, lt)[..., :halo]
              .transpose(0, 3, 1, 2, 4)
              .reshape(N, n_lt, s * Cp, halo))                    # (N, n_lt, s*Cp, H)

    # ---- fold parameters in the wrapper ----
    f32 = jnp.float32
    w_dw = jnp.pad(params["w_dw"].reshape(C, K).astype(f32), ((0, Cp - C), (0, 0)))
    w_pw = params["w_pw"].reshape(O, C).astype(f32)
    b_fused = params["b_pw"].astype(f32) + w_pw @ params["b_dw"].astype(f32)
    scale = params["bn_gamma"].astype(f32) * jax.lax.rsqrt(params["bn_var"].astype(f32) + eps)
    shift = params["bn_beta"].astype(f32) - params["bn_mean"].astype(f32) * scale
    pvec = jnp.stack([b_fused, scale, shift], axis=1)             # (O, 3)
    if Op > O:
        pvec = jnp.concatenate(
            [pvec, jnp.tile(jnp.array([[0.0, 1.0, 0.0]], f32), (Op - O, 1))], axis=0)
    w_pw_p = jnp.pad(w_pw, ((0, Op - O), (0, Cp - C))).astype(jnp.bfloat16)
    alpha = params["prelu_a"].reshape(1).astype(f32)

    kernel = make_sconv1d_kernel(K, s, lt, halo, Cp)
    const2 = lambda n, j: (0, 0)

    out_padded = pl.pallas_call(
        kernel,
        out_shape=jax.ShapeDtypeStruct((N, Op, n_lt * lt), f32),
        grid=(N, n_lt),
        in_specs=[
            pl.BlockSpec((1, s * Cp, lt), lambda n, j: (n, 0, j)),          # x tile
            pl.BlockSpec((1, 1, s * Cp, halo), lambda n, j: (n, j, 0, 0)),  # halo
            pl.BlockSpec((Cp, K), const2),                                  # depthwise w
            pl.BlockSpec((Op, Cp), const2),                                 # pointwise w
            pl.BlockSpec((Op, 3), const2),                                  # packed per-O params
            pl.BlockSpec(memory_space=pltpu.MemorySpace.SMEM),              # PReLU alpha
        ],
        out_specs=pl.BlockSpec((1, Op, lt), lambda n, j: (n, 0, j)),
        scratch_shapes=[pltpu.VMEM((s * Cp, lt + halo), jnp.bfloat16)],
        compiler_params=pltpu.CompilerParams(
            dimension_semantics=("parallel", "parallel"),
            vmem_limit_bytes=48 * 1024 * 1024),
    )(x_main, x_halo, w_dw, w_pw_p, pvec, alpha)

    return out_padded[:, :O, :Lout]


def reference_forward(x, params, *, kernel_size, stride=1, pad=0, eps=1e-5):
    """Pure-JAX reference mirroring the kernel's numerics (bf16 inputs to the
    pointwise matmul, f32 elsewhere; BatchNorm in eval mode)."""
    N, C, L = x.shape
    K, s = kernel_size, stride
    O = params["w_pw"].shape[0]
    Lout = (L + 2 * pad - K) // s + 1
    f32 = jnp.float32

    xb = x.astype(jnp.bfloat16).astype(f32)
    xpad = jnp.pad(xb, ((0, 0), (0, 0), (pad, pad)))
    w_dw = params["w_dw"].reshape(C, K).astype(f32)
    y = jnp.zeros((N, C, Lout), f32)
    for k in range(K):
        xk = xpad[:, :, k:k + (Lout - 1) * s + 1:s]
        y = y + w_dw[None, :, k:k + 1] * xk
    yb = y.astype(jnp.bfloat16).astype(f32)

    w_pw = params["w_pw"].reshape(O, C).astype(f32)
    w_pw_b = w_pw.astype(jnp.bfloat16).astype(f32)
    b_fused = params["b_pw"].astype(f32) + w_pw @ params["b_dw"].astype(f32)
    z = jnp.einsum("oc,ncl->nol", w_pw_b, yb) + b_fused.reshape(1, O, 1)

    a = params["prelu_a"].reshape(())
    z = jnp.where(z >= 0.0, z, a * z)

    scale = params["bn_gamma"] * jax.lax.rsqrt(params["bn_var"] + eps)
    shift = params["bn_beta"] - params["bn_mean"] * scale
    return z * scale.reshape(1, O, 1) + shift.reshape(1, O, 1)


def init_params(key, in_filters, out_filters, kernel_size):
    ks = jax.random.split(key, 6)
    return {
        # depthwise Conv1d(in, in, K, groups=in): weight (in, 1, K), bias (in,)
        "w_dw": 0.3 * jax.random.normal(ks[0], (in_filters, 1, kernel_size), jnp.float32),
        "b_dw": 0.1 * jax.random.normal(ks[1], (in_filters,), jnp.float32),
        # pointwise Conv1d(in, out, 1): weight (out, in, 1), bias (out,)
        "w_pw": 0.3 * jax.random.normal(ks[2], (out_filters, in_filters, 1), jnp.float32),
        "b_pw": 0.1 * jax.random.normal(ks[3], (out_filters,), jnp.float32),
        # PReLU default: single parameter, init 0.25
        "prelu_a": jnp.array([0.25], jnp.float32),
        # BatchNorm1d(out) inference-mode params / running stats
        "bn_gamma": jnp.ones((out_filters,), jnp.float32),
        "bn_beta": jnp.zeros((out_filters,), jnp.float32),
        "bn_mean": 0.05 * jax.random.normal(ks[4], (out_filters,), jnp.float32),
        "bn_var": 1.0 + 0.1 * jax.random.uniform(ks[5], (out_filters,), jnp.float32),
    }


if __name__ == "__main__":
    N, C_in, C_out, L = 2, 4, 8, 16
    K, STRIDE, PAD = 3, 1, 1

    key = jax.random.PRNGKey(0)
    k_x, k_p = jax.random.split(key)
    x = jax.random.normal(k_x, (N, C_in, L), jnp.float32)
    params = init_params(k_p, C_in, C_out, K)

    fwd = functools.partial(sconv1d_forward, kernel_size=K, stride=STRIDE, pad=PAD)
    out = jax.jit(fwd)(x, params)
    out = jax.block_until_ready(out)

    ref = reference_forward(x, params, kernel_size=K, stride=STRIDE, pad=PAD)
    Lout = (L + 2 * PAD - K) // STRIDE + 1
    assert out.shape == ref.shape == (N, C_out, Lout)
    assert jnp.allclose(out, ref, rtol=1e-3, atol=1e-3), "mismatch vs reference"

    print("KERNEL_OK")
</pallas_src>

<mosaic_0001>
module attributes {stable_mosaic.version = 11 : i64} {
  func.func @kernel(%arg0: i32, %arg1: i32, %arg2: memref<1x16x128xbf16, #tpu.memory_space<vmem>>, %arg3: memref<1x1x16x2xbf16, #tpu.memory_space<vmem>>, %arg4: memref<16x3xf32, #tpu.memory_space<vmem>>, %arg5: memref<8x16xbf16, #tpu.memory_space<vmem>>, %arg6: memref<8x3xf32, #tpu.memory_space<vmem>>, %arg7: memref<1xf32, #tpu.memory_space<smem>>, %arg8: memref<1x8x128xf32, #tpu.memory_space<vmem>>, %arg9: memref<16x130xbf16, #tpu.memory_space<vmem>>) attributes {dimension_semantics = [#tpu.dimension_semantics<parallel>, #tpu.dimension_semantics<parallel>], iteration_bounds = array<i64: 2, 1>, scalar_prefetch = 0 : i64, scratch_operands = 1 : i64, tpu.core_type = #tpu.core_type<tc>, window_params = [{transform_indices = @transform_0, window_bounds = array<i64: 1, 16, 128>}, {transform_indices = @transform_1, window_bounds = array<i64: 1, 1, 16, 2>}, {pipeline_mode = #tpu.pipeline_mode<synchronous>, transform_indices = @transform_2, window_bounds = array<i64: 16, 3>}, {pipeline_mode = #tpu.pipeline_mode<synchronous>, transform_indices = @transform_3, window_bounds = array<i64: 8, 16>}, {pipeline_mode = #tpu.pipeline_mode<synchronous>, transform_indices = @transform_4, window_bounds = array<i64: 8, 3>}, {transform_indices = @transform_5, window_bounds = array<i64: 1>}, {transform_indices = @transform_6, window_bounds = array<i64: 1, 8, 128>}]} {
    %c0 = arith.constant 0 : index
    %c0_0 = arith.constant 0 : index
    %c0_1 = arith.constant 0 : index
    %0 = vector.load %arg2[%c0, %c0_0, %c0_1] : memref<1x16x128xbf16, #tpu.memory_space<vmem>>, vector<1x16x128xbf16>
    %1 = vector.shape_cast %0 : vector<1x16x128xbf16> to vector<16x128xbf16>
    %c0_2 = arith.constant 0 : index
    %c0_3 = arith.constant 0 : index
    %2 = vector.load %arg9[%c0_2, %c0_3] : memref<16x130xbf16, #tpu.memory_space<vmem>>, vector<16x128xbf16>
    tpu.vector_store %arg9[%c0_2, %c0_3], %1 {strides = array<i32>} : memref<16x130xbf16, #tpu.memory_space<vmem>>, vector<16x128xbf16>,
    %c0_4 = arith.constant 0 : index
    %c0_5 = arith.constant 0 : index
    %c0_6 = arith.constant 0 : index
    %c0_7 = arith.constant 0 : index
    %3 = vector.load %arg3[%c0_4, %c0_5, %c0_6, %c0_7] : memref<1x1x16x2xbf16, #tpu.memory_space<vmem>>, vector<1x1x16x2xbf16>
    %4 = vector.shape_cast %3 : vector<1x1x16x2xbf16> to vector<16x2xbf16>
    %c0_8 = arith.constant 0 : index
    %c128 = arith.constant 128 : index
    %5 = vector.load %arg9[%c0_8, %c128] : memref<16x130xbf16, #tpu.memory_space<vmem>>, vector<16x2xbf16>
    tpu.vector_store %arg9[%c0_8, %c128], %4 {strides = array<i32>} : memref<16x130xbf16, #tpu.memory_space<vmem>>, vector<16x2xbf16>,
    %c0_9 = arith.constant 0 : index
    %c0_10 = arith.constant 0 : index
    %6 = vector.load %arg4[%c0_9, %c0_10] : memref<16x3xf32, #tpu.memory_space<vmem>>, vector<16x3xf32>
    %cst = arith.constant 0.000000e+00 : f32
    %7 = vector.broadcast %cst : f32 to vector<16x128xf32>
    %c0_11 = arith.constant 0 : index
    %c0_12 = arith.constant 0 : index
    %8 = vector.load %arg9[%c0_11, %c0_12] : memref<16x130xbf16, #tpu.memory_space<vmem>>, vector<16x128xbf16>
    %9 = arith.extf %8 : vector<16x128xbf16> to vector<16x128xf32>
    %10 = vector.extract_strided_slice %6 {offsets = [0, 0], sizes = [16, 1], strides = [1, 1]} : vector<16x3xf32> to vector<16x1xf32>
    %11 = vector.broadcast %10 : vector<16x1xf32> to vector<16x128xf32>
    %12 = arith.mulf %11, %9 : vector<16x128xf32>
    %13 = arith.addf %7, %12 : vector<16x128xf32>
    %c0_13 = arith.constant 0 : index
    %c1 = arith.constant 1 : index
    %14 = vector.load %arg9[%c0_13, %c1] : memref<16x130xbf16, #tpu.memory_space<vmem>>, vector<16x128xbf16>
    %15 = arith.extf %14 : vector<16x128xbf16> to vector<16x128xf32>
    %16 = vector.extract_strided_slice %6 {offsets = [0, 1], sizes = [16, 1], strides = [1, 1]} : vector<16x3xf32> to vector<16x1xf32>
    %17 = vector.broadcast %16 : vector<16x1xf32> to vector<16x128xf32>
    %18 = arith.mulf %17, %15 : vector<16x128xf32>
    %19 = arith.addf %13, %18 : vector<16x128xf32>
    %c0_14 = arith.constant 0 : index
    %c2 = arith.constant 2 : index
    %20 = vector.load %arg9[%c0_14, %c2] : memref<16x130xbf16, #tpu.memory_space<vmem>>, vector<16x128xbf16>
    %21 = arith.extf %20 : vector<16x128xbf16> to vector<16x128xf32>
    %22 = vector.extract_strided_slice %6 {offsets = [0, 2], sizes = [16, 1], strides = [1, 1]} : vector<16x3xf32> to vector<16x1xf32>
    %23 = vector.broadcast %22 : vector<16x1xf32> to vector<16x128xf32>
    %24 = arith.mulf %23, %21 : vector<16x128xf32>
    %25 = arith.addf %19, %24 : vector<16x128xf32>
    %26 = arith.truncf %25 : vector<16x128xf32> to vector<16x128xbf16>
    %c0_15 = arith.constant 0 : index
    %c0_16 = arith.constant 0 : index
    %27 = vector.load %arg5[%c0_15, %c0_16] : memref<8x16xbf16, #tpu.memory_space<vmem>>, vector<8x16xbf16>
    %cst_17 = arith.constant dense<0.000000e+00> : vector<8x128xf32>
    %28 = tpu.matmul %27, %26, %cst_17 {dimension_numbers = #tpu.dot_dimension_numbers<[1], [0], [0], [1], [0, 0, 1, 1], [], []>} : vector<8x16xbf16>, vector<16x128xbf16>, vector<8x128xf32> -> vector<8x128xf32>
    %c0_18 = arith.constant 0 : index
    %c0_19 = arith.constant 0 : index
    %29 = vector.load %arg6[%c0_18, %c0_19] : memref<8x3xf32, #tpu.memory_space<vmem>>, vector<8x1xf32>
    %30 = vector.broadcast %29 : vector<8x1xf32> to vector<8x128xf32>
    %31 = arith.addf %28, %30 : vector<8x128xf32>
    %c0_20 = arith.constant 0 : index
    %32 = memref.load %arg7[%c0_20] : memref<1xf32, #tpu.memory_space<smem>>
    %cst_21 = arith.constant 0.000000e+00 : f32
    %33 = vector.broadcast %cst_21 : f32 to vector<8x128xf32>
    %34 = arith.cmpf oge, %31, %33 : vector<8x128xf32>
    %35 = vector.broadcast %32 : f32 to vector<8x128xf32>
    %36 = arith.mulf %35, %31 : vector<8x128xf32>
    %37 = arith.select %34, %31, %36 : vector<8x128xi1>, vector<8x128xf32>
    %c0_22 = arith.constant 0 : index
    %c1_23 = arith.constant 1 : index
    %38 = vector.load %arg6[%c0_22, %c1_23] : memref<8x3xf32, #tpu.memory_space<vmem>>, vector<8x1xf32>
    %39 = vector.broadcast %38 : vector<8x1xf32> to vector<8x128xf32>
    %40 = arith.mulf %37, %39 : vector<8x128xf32>
    %c0_24 = arith.constant 0 : index
    %c2_25 = arith.constant 2 : index
    %41 = vector.load %arg6[%c0_24, %c2_25] : memref<8x3xf32, #tpu.memory_space<vmem>>, vector<8x1xf32>
    %42 = vector.broadcast %41 : vector<8x1xf32> to vector<8x128xf32>
    %43 = arith.addf %40, %42 : vector<8x128xf32>
    %c0_26 = arith.constant 0 : index
    %c0_27 = arith.constant 0 : index
    %c0_28 = arith.constant 0 : index
    %44 = vector.load %arg8[%c0_26, %c0_27, %c0_28] : memref<1x8x128xf32, #tpu.memory_space<vmem>>, vector<1x8x128xf32>
    %45 = vector.shape_cast %44 : vector<1x8x128xf32> to vector<8x128xf32>
    %46 = vector.shape_cast %43 : vector<8x128xf32> to vector<1x8x128xf32>
    tpu.vector_store %arg8[%c0_26, %c0_27, %c0_28], %46 {strides = array<i32>} : memref<1x8x128xf32, #tpu.memory_space<vmem>>, vector<1x8x128xf32>,
    return
  }
  func.func @transform_0(%arg0: i32, %arg1: i32) -> (i32, i32, i32) {
    %c0_i32 = arith.constant 0 : i32
    %c0_i32_0 = arith.constant 0 : i32
    return %arg0, %c0_i32, %arg1 : i32, i32, i32
  }
  func.func @transform_1(%arg0: i32, %arg1: i32) -> (i32, i32, i32, i32) {
    %c0_i32 = arith.constant 0 : i32
    %c0_i32_0 = arith.constant 0 : i32
    %c0_i32_1 = arith.constant 0 : i32
    return %arg0, %arg1, %c0_i32, %c0_i32_0 : i32, i32, i32, i32
  }
  func.func @transform_2(%arg0: i32, %arg1: i32) -> (i32, i32) {
    %c0_i32 = arith.constant 0 : i32
    %c0_i32_0 = arith.constant 0 : i32
    %c0_i32_1 = arith.constant 0 : i32
    return %c0_i32, %c0_i32_0 : i32, i32
  }
  func.func @transform_3(%arg0: i32, %arg1: i32) -> (i32, i32) {
    %c0_i32 = arith.constant 0 : i32
    %c0_i32_0 = arith.constant 0 : i32
    %c0_i32_1 = arith.constant 0 : i32
    return %c0_i32, %c0_i32_0 : i32, i32
  }
  func.func @transform_4(%arg0: i32, %arg1: i32) -> (i32, i32) {
    %c0_i32 = arith.constant 0 : i32
    %c0_i32_0 = arith.constant 0 : i32
    %c0_i32_1 = arith.constant 0 : i32
    return %c0_i32, %c0_i32_0 : i32, i32
  }
  func.func @transform_5(%arg0: i32, %arg1: i32) -> i32 {
    %c0_i32 = arith.constant 0 : i32
    %c0_i32_0 = arith.constant 0 : i32
    return %c0_i32 : i32
  }
  func.func @transform_6(%arg0: i32, %arg1: i32) -> (i32, i32, i32) {
    %c0_i32 = arith.constant 0 : i32
    %c0_i32_0 = arith.constant 0 : i32
    return %arg0, %c0_i32, %arg1 : i32, i32, i32
  }
}

</mosaic_0001>

<bundles_post_ra>
// kernel: sconv1d_forward.1
= control target key start
LH: loop header
LB: loop body
LE: loop exit
PB: predicated region body
PF: predicated region fallthrough
CT: control target
= control target key end

     0   :  { %s1003_s0 = inlined_call_operand.vmem [shape: bf16[2,16,256], index: 0, kind: input, shape index: {}]   ;;  %s1004_s1 = inlined_call_operand.vmem [shape: bf16[2,1,16,2], index: 1, kind: input, shape index: {}]   ;;  %s1005_s2 = inlined_call_operand.vmem [shape: f32[16,3], index: 2, kind: input, shape index: {}]   ;;  %s1006_s3 = inlined_call_operand.vmem [shape: bf16[8,16], index: 3, kind: input, shape index: {}]   ;;  %s1007_s4 = inlined_call_operand.vmem [shape: f32[8,3], index: 4, kind: input, shape index: {}]   ;;  %s1008_s5 = inlined_call_operand.<no memory space> [shape: f32[1], index: 5, kind: input, shape index: {}]   ;;  %s1009_s6 = inlined_call_operand.hbm [shape: f32[2,8,128], index: 6, kind: output, shape index: {}]  }
   0x1   :  { %11 = sst [smem:[#allocation3]] %s1008_s5 }
   0x2   :  { %12 = vsyncpa [#allocation6], 0 }
   0x3   :  { %14 = vsyncpa [#allocation6 + $0x1], 0  ;;  %s861_s23 = smov 0   ;;  %s863_s24 = smov 0  }
   0x4   :  { %s865_s25 = smov 0   ;;  %s867_s26 = smov 0  }
   0x5   :  { %s869_s27 = smov 0   ;;  %s871_s28 = smov 0  }
   0x6 LB: > { %s635_s5 = sadd.s32 4294967295, %s813_s28   ;;  %s636_s29 = sadd.s32 4294967294, %s813_s28   ;;  %s813_s28 = sphi %s871_s28, %s20_s28   ;;  %s809_s27 = sphi %s869_s27, %s1016_s27   ;;  %s805_s26 = sphi %s867_s26, %s1015_s26   ;;  %s801_s25 = sphi %s865_s25, %s1014_s25   ;;  %s797_s24 = sphi %s863_s24, %s1013_s24   ;;  %s793_s23 = sphi %s861_s23, %s1012_s23  }
   0x7   : > { %s32_s30 = sadd.s32 1, %s809_s27  ;;  %s41_s7 = sadd.s32 1, %s801_s25 }
   0x8   : > { %p34_p0 = scmp.ge.s32.totalorder %s32_s30, 2  ;;  %p48_p1 = scmp.ne.s32.totalorder %s801_s25, %s797_s24 }
   0x9   : > { %p49_p2 = scmp.eq.s32.totalorder %s813_s28, 0  ;;  %p192_p3 = scmp.eq.s32.totalorder %s635_s5, 1 }
   0xa   : > { %s1018_s30 = smov (%p34_p0, %s32_s30), 0  ;;  %p197_p6 = scmp.ne.s32.totalorder %s797_s24, %s793_s23 }
   0xb   : > { %p50_p4 = por %p49_p2, %p48_p1  ;;  %p900_p5 = por %p192_p3, %p48_p1 }
   0xc   : > { %s36_s9 = ssub.s32 %s809_s27, %s1018_s30  ;;  %p198_p8 = scmp.eq.s32.totalorder %s636_s29, 1 }
   0xd   : > { %p39_p7 = scmp.eq.s32.totalorder %s36_s9, 0  ;;  %p638_p10 = scmp.ge.s32.totalorder %s813_s28, 2 }
   0xe   : > { %p911_p9 = por %p198_p8, %p197_p6 }
   0xf   : > { %s909_s10 = scalar_select %p39_p7, %s801_s25, %s41_s7  }
  0x10   : > { %226 = sbr.rel (%p638_p10) target bundleno = 30 (0x1e), region = 32 }
  0x17   : > { %229 = sbr.rel (!%p50_p4) target bundleno = 30 (0x1e), region = 36  ;;  %s231_s12 = sand.u32 (%p50_p4), 1, %s801_s25  }
  0x18   : > { %s654_s13 = sshll.u32 (%p50_p4), %s809_s27, 4  ;;  %s639_s14 = sshll.u32 (%p50_p4), %s231_s12, 3 }
  0x19   : > { %s237_s17 = scalar_lea.vmem (%p50_p4), %s1003_s0, %s654_s13  ;;  %s233_s18 = scalar_lea.vmem (%p50_p4), [#allocation4], %s639_s14 }
  0x1a   : > { %v253_v0 = vld [vmem:[%s237_s17] sm:$0xf] (%p50_p4)  ;;  %v255_v1 = vld [vmem:[%s237_s17 + $0x8] sm:$0xf] (%p50_p4) }
  0x1b   : > { %254 = vst [vmem:[%s233_s18] sm:$0xf] (%p50_p4), %v253_v0  ;;  %256 = vst [vmem:[%s233_s18 + $0x4] sm:$0xf] (%p50_p4), %v255_v1 }
  0x1e PF: > { %p642_p11 = scmp.ge.s32.totalorder %s813_s28, 1  ;;  %p294_p12 = scmp.lt.s32.totalorder %s813_s28, 3 }
  0x20   : > { %p295_p13 = pnand %p642_p11, %p294_p12 }
  0x21   : > { %v368_v2 = vld [vmem:[%s1005_s2] sm:$0xff] (!%p295_p13)  ;;  %s301_s21 = sand.u32 (!%p295_p13), 1, %s797_s24   ;;  %v815_v3 = vmov (!%p295_p13), 1   ;;  %v816_v4 = vmov (!%p295_p13), 2   ;;  %p339_p0 = scmp.lt.s32.totalorder (!%p295_p13), %s805_s26, 1  ;;  %v369_v5 = vld [vmem:[%s1005_s2 + $0x8] sm:$0xff] (!%p295_p13) }
  0x22   : > { %298 = sbr.rel (%p295_p13) target bundleno = 535 (0x217), region = 81  ;;  %726 = vset.pattern.permute.xlu0 (!%p295_p13), %v815_v3  ;;  %727 = vset.pattern.permute.xlu1 (!%p295_p13), %v816_v4  ;;  %s931_s22 = sshll.u32 (!%p295_p13), %s301_s21, 3  ;;  %vm366_vm0 = vcmask (!%p295_p13), 15360   ;;  %v817_v8 = vmov (!%p295_p13), 0   ;;  %v819_v19 = vmov (!%p295_p13), 0.0   ;;  %vm820_vm1 = vmmov (!%p295_p13), 0  }
  0x23   : > { %394 = vperm.xlu0 (!%p295_p13), %726, %v368_v2   ;;  %425 = vperm.xlu1 (!%p295_p13), %727, %v368_v2   ;;  %s303_s9 = scalar_lea.vmem (!%p295_p13), [#allocation4], %s931_s22  ;;  %s818_s16 = smov (!%p295_p13), 127   ;;  %v457_v27 = vld [vmem:[%s1007_s4] sm:$0xff] (!%p295_p13)  ;;  %vm417_vm2 = vcmask (!%p295_p13), 1039360   ;;  %vm448_vm3 = vcmask (!%p295_p13), 1031168   ;;  %vm463_vm4 = vcmask (!%p295_p13), 130048  }
  0x24   : > { %v733_v6 = vld [vmem:[%s303_s9] sm:$0xff] (!%p295_p13)   ;;  %658 = vmatprep.subr.bf16.mxu0 (!%p295_p13), %v819_v19  ;;  %660 = vmatprep.mubr.msk.bf16.mxu0 (!%p295_p13), %vm820_vm1, %v819_v19  ;;  %s821_s17 = smov (!%p295_p13), 126   ;;  %v456_v49 = vld [vmem:[%s1006_s3] sm:$0xf] (!%p295_p13)  ;;  %s507_s29 = sld [smem:[#allocation3]] (!%p295_p13) }
  0x25   : > { %v389_v10 = vunpack.c.l.bf16 (!%p295_p13), %v733_v6  ;;  %v391_v15 = vunpack.c.h.bf16 (!%p295_p13), %v733_v6  ;;  %s338_s9 = scalar_lea.vmem (!%p295_p13), [#allocation5], %s931_s22 }
  0x27   : > { %398 = vperm.xlu0 (!%p295_p13), %726, %v369_v5   ;;  %429 = vperm.xlu1 (!%p295_p13), %727, %v369_v5  }
  0x29   : > { %s340_s7 = scalar_select %p339_p0, %s805_s26, 1 }
  0x2a   : > { %v509_v52 = vstv %s507_s29 }
  0x2b   : > { %s655_s12 = sshll.u32 %s340_s7, 3  ;;  %729 = vset.pattern.permute.xlu1 %v817_v8  ;;  %728 = vset.pattern.permute.xlu0 %v817_v8  ;;  %s651_s7 = sshll.u32 %s805_s26, 7 }
  0x2c   : > { %s347_s15 = scalar_lea.vmem %s1004_s1, %s655_s12  ;;  %380 = vperm.xlu1 %729, %v369_v5   ;;  %375 = vperm.xlu0 %728, %v368_v2   ;;  %s538_s12 = sshll.u32 %s338_s9, 4  ;;  %s955_s12 = int_to_ptr.vmem [resolvable:$true] %s538_s12 }
  0x2d   : > { %v734_v7 = vld [vmem:[%s347_s15] sm:$0xff]   ;;  %s953_s15 = scalar_lea.hbm %s1009_s6, %s651_s7  ;;  %s822_s26 = smov [#allocation5]  }
  0x2e   : > { %367 = vst.msk [vmem:[#allocation2 + $0x8] sm:$0xff] %vm366_vm0, %v734_v7  ;;  %s739_s22 = sshll.u32 %s822_s26, 4  ;;  %s740_s22 = int_to_ptr.vmem [resolvable:$false] %s739_s22 }
  0x2f   : > { %s741_s18 = scalar_lea.vmem %s740_s22, 256  ;;  %p742_p4 = scmp.lt.s32.totalorder %s955_s12, %s740_s22 }
  0x30   : > { %730 = vset.pattern.permute.xlu0 %v815_v3 }
  0x35   : > { %v388_v9 = vld [vmem:[#allocation2 + $0x8] sm:$0xff] }
  0x36   : > { %v390_v11 = vunpack.c.l.bf16 %v388_v9  ;;  %v392_v16 = vunpack.c.h.bf16 %v388_v9 }
  0xa2   : > { %v395_v12 = vpop.permute.xlu0 %394  ;;  %v426_v17 = vpop.permute.xlu1 %425 }
  0xa3   : > { %v401_v13 = vmul.f32 %v395_v12, %v389_v10  ;;  %v402_v14 = vmul.f32 %v395_v12, %v390_v11  ;;  %v432_v22 = vmul.f32 %v426_v17, %v389_v10  ;;  %v433_v23 = vmul.f32 %v426_v17, %v390_v11 }
  0xa5   : > { %411 = vrot.lane.b32.xlu0 %v402_v14, %s818_s16  ;;  %409 = vrot.lane.b32.xlu1 %v401_v13, %s818_s16 }
  0xa6   : > { %v399_v18 = vpop.permute.xlu0 %398  ;;  %v430_v24 = vpop.permute.xlu1 %429 }
  0xa7   : > { %v403_v20 = vmul.f32 %v399_v18, %v391_v15  ;;  %v404_v21 = vmul.f32 %v399_v18, %v392_v16  ;;  %v434_v25 = vmul.f32 %v430_v24, %v391_v15  ;;  %v435_v26 = vmul.f32 %v430_v24, %v392_v16 }
  0xa9   : > { %415 = vrot.lane.b32.xlu0 %v404_v21, %s818_s16  ;;  %413 = vrot.lane.b32.xlu1 %v403_v20, %s818_s16  ;;  %s524_s16 = scalar_lea.sflag [#allocation6], %s301_s21 }
  0xab   : > { %v381_v28 = vpop.permute.xlu1 %380  ;;  %v376_v29 = vpop.permute.xlu0 %375 }
  0xac   : > { %v384_v38 = vmul.f32 %v391_v15, %v381_v28  ;;  %v383_v39 = vmul.f32 %v389_v10, %v376_v29 }
  0xad   : > { %442 = vrot.lane.b32.xlu0 %v433_v23, %s821_s17  ;;  %440 = vrot.lane.b32.xlu1 %v432_v22, %s821_s17 }
  0xb1   : > { %446 = vrot.lane.b32.xlu0 %v435_v26, %s821_s17  ;;  %444 = vrot.lane.b32.xlu1 %v434_v25, %s821_s17  ;;  %s735_s17 = scalar_lea.vmem %s955_s12, 128 }
  0xb2   : > { %p736_p1 = scmp.ne.s32.totalorder %s955_s12, %s735_s17  ;;  %p743_p6 = scmp.lt.s32.totalorder %s741_s18, %s735_s17 }
  0xb4   : > { %p737_p2 = pnand %p736_p1, %p900_p5  ;;  %p744_p7 = por %p743_p6, %p742_p4 }
  0xb5   : > { %460 = vperm.xlu1 %729, %v457_v27   ;;  %513 = vperm.xlu0 %730, %v457_v27  }
  0xb6   : > { %p738_p3 = pneg %p737_p2 }
  0xb8   : > { %p745_p8 = pnand %p744_p7, %p738_p3 }
  0xb9   : > { %731 = vset.pattern.permute.xlu1 %v816_v4  ;;  %732 = vset.pattern.permute.xlu0 %v816_v4 }
  0xba   : > { %518 = vperm.xlu1 %731, %v457_v27  }
 0x117   : > { %v412_v30 = vpop.permute.xlu0 %411  ;;  %v410_v31 = vpop.permute.xlu1 %409 }
 0x118   : > { %v418_v36 = vsel %vm417_vm2, %v410_v31, %v412_v30 }
 0x119   : > { %v422_v41 = vadd.f32 %v418_v36, %v383_v39 }
 0x11b   : > { %v416_v32 = vpop.permute.xlu0 %415  ;;  %v414_v33 = vpop.permute.xlu1 %413 }
 0x11c   : > { %v419_v37 = vsel %vm417_vm2, %v414_v33, %v416_v32 }
 0x11d   : > { %v423_v42 = vadd.f32 %v419_v37, %v384_v38 }
 0x11f   : > { %v443_v34 = vpop.permute.xlu0 %442  ;;  %v441_v35 = vpop.permute.xlu1 %440 }
 0x120   : > { %v449_v40 = vsel %vm448_vm3, %v441_v35, %v443_v34 }
 0x121   : > { %v453_v46 = vadd.f32 %v449_v40, %v422_v41 }
 0x123   : > { %v447_v43 = vpop.permute.xlu0 %446  ;;  %v445_v44 = vpop.permute.xlu1 %444 }
 0x124   : > { %v450_v45 = vsel %vm448_vm3, %v445_v44, %v447_v43 }
 0x125   : > { %v454_v47 = vadd.f32 %v450_v45, %v423_v42 }
 0x127   : > { %v455_v48 = vpack.c.bf16 %v454_v47, %v453_v46 }
 0x129   : > { %659 = vmatpush3.bf16.msra.mxu0 %v455_v48 }
 0x12c   : > { %661 = vmatmul.mubr.msk.bf16.vlgmr.msra.gmra.mrb[0].mxu0 %vm463_vm4, %v456_v49 }
 0x134   : > { %v461_v50 = vpop.permute.xlu1 %460  ;;  %v514_v58 = vpop.permute.xlu0 %513 }
 0x139   : > { %v519_v60 = vpop.permute.xlu1 %518 }
 0x1ff   : > { %v501_v51 = vpop.f32.mrb[0].mxu0 }
 0x200   : > { %v502_v53 = vadd.f32 %v501_v51, %v461_v50  ;;  %v662_v54 = vpop.f32.mrb[1].mxu0 }
 0x201   : > { %v504_v55 = vpop.f32.mrb[2].mxu0 }
 0x202   : > { %v510_v56 = vmul.f32 %v509_v52, %v502_v53  ;;  %v663_v57 = vpop.f32.mrb[3].mxu0  ;;  %vm508_vm5 = vcmp.ge.f32.partialorder %v502_v53, 0.0 }
 0x204   : > { %v511_v59 = vsel %vm508_vm5, %v502_v53, %v510_v56 }
 0x205   : > { %v516_v61 = vmul.f32 %v514_v58, %v511_v59 }
 0x207   : > { %v521_v62 = vadd.f32 %v519_v60, %v516_v61 }
 0x209   : > { %522 = vst [vmem:[%s338_s9] sm:$0xff] %v521_v62 }
 0x20a   : > { %748 = shalt.err (!%p745_p8)
}
 0x20b   : > { %s749_s21 = scalar_lea.hbm %s953_s15, 128  ;;  %s753_s5 = scalar_lea.hbm %s1009_s6, 256 }
 0x20c   : > { %p750_p11 = scmp.ne.s32.totalorder %s953_s15, %s749_s21  ;;  %p754_p0 = scmp.lt.u32.totalorder %s953_s15, %s1009_s6 }
 0x20d   : > { %p755_p1 = scmp.lt.u32.totalorder %s753_s5, %s749_s21  ;;  %p757_p3 = scmp.lt.u32.totalorder %s749_s21, %s953_s15 }
 0x20e   : > { %p751_p12 = pnand %p750_p11, %p900_p5 }
 0x20f   : > { %p756_p2 = por %p755_p1, %p754_p0 }
 0x210   : > { %p752_p13 = pneg %p751_p12 }
 0x211   : > { %p758_p4 = por %p757_p3, %p756_p2 }
 0x213   : > { %p759_p6 = pnand %p758_p4, %p752_p13 }
 0x215   : > { %762 = shalt.err (!%p759_p6)
}
 0x216   : > { %664 = dma.vmem_to_hbm [thread:$0]  (%p900_p5), %s955_s12, 128, %s953_s15, %s524_s16  }
 0x217 PF: > { %s550_s9 = sand.u32 1, %s793_s23   ;;  %p667_p7 = pnand %p638_p10, %p911_p9 }
 0x218   : > { %s551_s13 = scalar_lea.sflag [#allocation6], %s550_s9 }
 0x219   : > { %788 = dma.done.wait (!%p667_p7), %s551_s13, 128  }
 0x21a   : > { %790 = vsyncadd (!%p667_p7), %s551_s13, 4294967168  ;;  %s20_s28 = sadd.s32 1, %s813_s28   ;;  %s1012_s23 = smov %s797_s24 }
 0x21b   : > { %p17_p8 = scmp.ge.s32.totalorder %s20_s28, 4   ;;  %s1013_s24 = smov %s801_s25 }
 0x21c   : > { %s1014_s25 = smov %s909_s10  ;;  %s1015_s26 = smov %s809_s27 }
 0x21d   : > { %s1016_s27 = smov %s1018_s30  ;;  %19 = sbr.rel (!%p17_p8) target bundleno = 6 (0x6), region = 128 }
 0x224   :  { %556 = vsyncpa [#allocation6], 1 }
 0x225   :  { %558 = vsyncpa [#allocation6 + $0x1], 1 }

</bundles_post_ra>
